<compile_context>
chip_gen: v5e
topology: v5e:2x2
jax: 0.10.0
libtpu: 0.0.40
codegen_flags: <defaults>
</compile_context>

<pallas_src>
import math
from functools import partial

import jax
import jax.numpy as jnp
from jax.experimental import pallas as pl
from jax.experimental.pallas import tpu as pltpu

LANE = 128      # vreg lane width
SUBLANE = 8     # vreg sublane count
_MiB = 1024 * 1024


def _round_up(x, m):
    return ((x + m - 1) // m) * m


def _mlp_fused_kernel(x_ref, *refs, num_layers: int):
    """Whole-MLP kernel; one grid step = one tile of TM rows.

    Ref order after x_ref: w0, b0, w1, b1, ..., w_{L-1}, b_{L-1}, out_ref.
      x_ref  : (TM, in_pad0)          f32 padded input rows
      w_i    : (in_pad_i, out_pad_i)  bf16 pre-transposed, zero-padded weight
      b_i    : (1, out_pad_i)         f32 zero-padded bias
      out_ref: (TM, out_pad_last)     f32 -- only the last layer touches HBM
    """
    out_ref = refs[2 * num_layers]
    act = x_ref[...]                                  # f32 value, stays on-chip
    for i in range(num_layers):                       # static unroll over layers
        w_ref = refs[2 * i]
        b_ref = refs[2 * i + 1]
        acc = jnp.dot(act.astype(jnp.bfloat16), w_ref[...],
                      preferred_element_type=jnp.float32)   # MXU bf16xbf16 -> f32
        acc = acc + b_ref[...]                               # f32 epilogue
        if i < num_layers - 1:
            act = jnp.maximum(acc, 0.0)                      # ReLU, never hits HBM
        else:
            out_ref[...] = acc.astype(out_ref.dtype)


def mlp_fused_forward(x_pad, weights_t_pad, biases_pad, *, tm,
                      vmem_limit_bytes, single_buffer_weights):
    """x_pad: (M_pad, in_pad0) f32; weights_t_pad[i]: (in_pad_i, out_pad_i) bf16;
    biases_pad[i]: (1, out_pad_i) f32."""
    m_pad, in_pad0 = x_pad.shape
    num_layers = len(weights_t_pad)
    out_pad = weights_t_pad[-1].shape[1]
    assert m_pad % tm == 0

    # Weights/biases use a constant index_map -> DMA'd once and resident across
    # all M tiles. Buffered(1) avoids a useless second buffer for them (halves
    # their VMEM footprint; matters most on v7x's 64 MiB/TC).
    w_kwargs = dict(pipeline_mode=pl.Buffered(1)) if single_buffer_weights else {}

    in_specs = [pl.BlockSpec((tm, in_pad0), lambda i: (i, 0))]
    operands = [x_pad]
    for w_t, b in zip(weights_t_pad, biases_pad):
        d_in, d_out = w_t.shape
        in_specs.append(pl.BlockSpec((d_in, d_out), lambda i: (0, 0), **w_kwargs))
        in_specs.append(pl.BlockSpec((1, d_out), lambda i: (0, 0), **w_kwargs))
        operands += [w_t, b]

    return pl.pallas_call(
        partial(_mlp_fused_kernel, num_layers=num_layers),
        out_shape=jax.ShapeDtypeStruct((m_pad, out_pad), jnp.float32),
        grid_spec=pltpu.PrefetchScalarGridSpec(
            num_scalar_prefetch=0,
            grid=(m_pad // tm,),
            in_specs=in_specs,
            out_specs=pl.BlockSpec((tm, out_pad), lambda i: (i, 0)),
        ),
        compiler_params=pltpu.CompilerParams(
            # "parallel": shards the M-tile grid across both TensorCores on v7x;
            # no-op on single-TC v5e/v6e.
            dimension_semantics=("parallel",),
            vmem_limit_bytes=vmem_limit_bytes,
        ),
    )(*operands)


class MLPPallas:
    """Mirror of the PyTorch MLP: Linear layers with ReLU between all but the last."""

    def __init__(self, input_dim, hidden_dim, output_dim, num_layers, key):
        self.num_layers = num_layers
        self.input_dim = input_dim
        self.output_dim = output_dim
        h = [hidden_dim] * (num_layers - 1)
        in_dims = [input_dim] + h
        out_dims = h + [output_dim]
        # Per-layer 128-lane-aligned padding. Chained dims are identical
        # (in_dims[i+1] == out_dims[i]) so activation widths line up layer-to-layer.
        # (On v6e/v7x, naturally-large dims could be 256-aligned to fill the
        #  256x256 MXU; kept 128-aligned here to avoid over-padding small dims.)
        self.in_pads = [_round_up(d, LANE) for d in in_dims]
        self.out_pads = [_round_up(d, LANE) for d in out_dims]

        self.weights = []    # PyTorch layout (out, in), f32 (reference math only)
        self.biases = []
        self.w_t_pad = []    # (in_pad, out_pad) bf16, pre-transposed + zero-padded
        self.b_pad = []      # (1, out_pad) f32, zero-padded
        for n, k_out, ip, op_ in zip(in_dims, out_dims, self.in_pads, self.out_pads):
            key, kw, kb = jax.random.split(key, 3)
            bound = 1.0 / math.sqrt(n)   # matches nn.Linear default init range
            w = jax.random.uniform(kw, (k_out, n), jnp.float32, -bound, bound)
            b = jax.random.uniform(kb, (k_out,), jnp.float32, -bound, bound)
            self.weights.append(w)
            self.biases.append(b)
            self.w_t_pad.append(
                jnp.pad(w.T, ((0, ip - n), (0, op_ - k_out))).astype(jnp.bfloat16))
            self.b_pad.append(jnp.pad(b, (0, op_ - k_out)).reshape(1, op_))

        self._weight_bytes = (sum(int(w.size) * 2 for w in self.w_t_pad)
                              + sum(int(b.size) * 4 for b in self.b_pad))
        self._max_width = max(self.in_pads + self.out_pads)
        self._single_buffer_weights = True     # flipped off if pipeline_mode unsupported
        self._checked_pipeline_mode = False

    def _choose_tm(self, M):
        m8 = _round_up(M, SUBLANE)
        if m8 <= 256:
            # Small batch: split into two row tiles when possible so both
            # TensorCores on a 2-TC chip (v7x) get work.
            if m8 >= 2 * SUBLANE:
                return _round_up((m8 + 1) // 2, SUBLANE)
            return m8
        budget = 44 * _MiB

        def fits(tm):
            # resident weights + x/out double buffers + live f32 activations
            return self._weight_bytes + 6 * tm * self._max_width * 4 <= budget

        cands = [tm for tm in (512, 256, 128) if fits(tm)] or [128]
        # Minimize padded rows; prefer the larger tile on ties (~0.35us/step overhead).
        return min(cands, key=lambda tm: (_round_up(M, tm), -tm))

    def _vmem_limit(self, tm):
        wb = self._weight_bytes * (1 if self._single_buffer_weights else 2)
        est = (wb
               + 2 * tm * self.in_pads[0] * 4       # double-buffered x tiles
               + 2 * tm * self.out_pads[-1] * 4     # double-buffered out tiles
               + 2 * tm * self._max_width * 4)      # live f32 activations
        # >= 32 MiB (at/above all default scoped limits), <= 48 MiB (fits v7x 64 MiB/TC).
        return int(min(48 * _MiB, max(32 * _MiB, 2 * est)))

    def __call__(self, x):
        # x: (..., input_dim). Flatten leading dims -> (M, input_dim).
        lead_shape = x.shape[:-1]
        M = 1
        for d in lead_shape:
            M *= d
        x2d = x.reshape(M, x.shape[-1]).astype(jnp.float32)

        tm = self._choose_tm(M)
        m_pad = _round_up(M, tm)
        # Pad only to (m_pad, in_pad0) -- zero rows/cols are exact.
        x_pad = jnp.pad(x2d, ((0, m_pad - M), (0, self.in_pads[0] - x.shape[-1])))

        try:
            out_pad = mlp_fused_forward(
                x_pad, self.w_t_pad, self.b_pad, tm=tm,
                vmem_limit_bytes=self._vmem_limit(tm),
                single_buffer_weights=self._single_buffer_weights)
            if self._single_buffer_weights and not self._checked_pipeline_mode:
                jax.block_until_ready(out_pad)   # surface any deferred lowering error once
                self._checked_pipeline_mode = True
        except Exception:
            if not self._single_buffer_weights:
                raise
            # Fallback for JAX builds that reject BlockSpec.pipeline_mode /
            # Buffered(1): use default double-buffered weight blocks.
            self._single_buffer_weights = False
            self._checked_pipeline_mode = True
            out_pad = mlp_fused_forward(
                x_pad, self.w_t_pad, self.b_pad, tm=tm,
                vmem_limit_bytes=self._vmem_limit(tm),
                single_buffer_weights=False)

        out = out_pad[:M, :self.output_dim]
        return out.reshape(*lead_shape, self.output_dim)


if __name__ == "__main__":
    key = jax.random.PRNGKey(0)
    key, kx, kp = jax.random.split(key, 3)

    # Small shapes consistent with the module: bbox-regression-style MLP head.
    batch, seq = 2, 8
    input_dim, hidden_dim, output_dim, num_layers = 32, 32, 4, 3

    mlp = MLPPallas(input_dim, hidden_dim, output_dim, num_layers, kp)
    x = jax.random.normal(kx, (batch, seq, input_dim), jnp.float32)

    out = mlp(x)
    out = jax.block_until_ready(out)

    # Pure-JAX reference of the same quantized math (bf16 weights/activations,
    # f32 accumulation, f32 bias/ReLU) -- isolates kernel bugs from bf16 rounding.
    ref = x.reshape(-1, input_dim).astype(jnp.float32)
    for i, (w, b) in enumerate(zip(mlp.weights, mlp.biases)):
        ref = jnp.dot(ref.astype(jnp.bfloat16), w.T.astype(jnp.bfloat16),
                      preferred_element_type=jnp.float32) + b
        if i < num_layers - 1:
            ref = jnp.maximum(ref, 0.0)
    ref = ref.reshape(batch, seq, output_dim)

    assert out.shape == (batch, seq, output_dim)
    assert jnp.allclose(out, ref, atol=5e-3, rtol=5e-3), \
        float(jnp.max(jnp.abs(out - ref)))

    print("KERNEL_OK")
</pallas_src>

<mosaic_0001>
module attributes {stable_mosaic.version = 11 : i64} {
  func.func @_mlp_fused_kernel(%arg0: i32, %arg1: memref<8x128xf32, #tpu.memory_space<vmem>>, %arg2: memref<128x128xbf16, #tpu.memory_space<vmem>>, %arg3: memref<1x128xf32, #tpu.memory_space<vmem>>, %arg4: memref<128x128xbf16, #tpu.memory_space<vmem>>, %arg5: memref<1x128xf32, #tpu.memory_space<vmem>>, %arg6: memref<128x128xbf16, #tpu.memory_space<vmem>>, %arg7: memref<1x128xf32, #tpu.memory_space<vmem>>, %arg8: memref<8x128xf32, #tpu.memory_space<vmem>>) attributes {dimension_semantics = [#tpu.dimension_semantics<parallel>], iteration_bounds = array<i64: 2>, scalar_prefetch = 0 : i64, scratch_operands = 0 : i64, tpu.core_type = #tpu.core_type<tc>, window_params = [{transform_indices = @transform_0, window_bounds = array<i64: 8, 128>}, {pipeline_mode = #tpu.pipeline_mode<synchronous>, transform_indices = @transform_1, window_bounds = array<i64: 128, 128>}, {pipeline_mode = #tpu.pipeline_mode<synchronous>, transform_indices = @transform_2, window_bounds = array<i64: 1, 128>}, {pipeline_mode = #tpu.pipeline_mode<synchronous>, transform_indices = @transform_3, window_bounds = array<i64: 128, 128>}, {pipeline_mode = #tpu.pipeline_mode<synchronous>, transform_indices = @transform_4, window_bounds = array<i64: 1, 128>}, {pipeline_mode = #tpu.pipeline_mode<synchronous>, transform_indices = @transform_5, window_bounds = array<i64: 128, 128>}, {pipeline_mode = #tpu.pipeline_mode<synchronous>, transform_indices = @transform_6, window_bounds = array<i64: 1, 128>}, {transform_indices = @transform_7, window_bounds = array<i64: 8, 128>}]} {
    %c0 = arith.constant 0 : index
    %c0_0 = arith.constant 0 : index
    %0 = vector.load %arg1[%c0, %c0_0] : memref<8x128xf32, #tpu.memory_space<vmem>>, vector<8x128xf32>
    %1 = arith.truncf %0 : vector<8x128xf32> to vector<8x128xbf16>
    %c0_1 = arith.constant 0 : index
    %c0_2 = arith.constant 0 : index
    %2 = vector.load %arg2[%c0_1, %c0_2] : memref<128x128xbf16, #tpu.memory_space<vmem>>, vector<128x128xbf16>
    %cst = arith.constant dense<0.000000e+00> : vector<8x128xf32>
    %3 = tpu.matmul %1, %2, %cst {dimension_numbers = #tpu.dot_dimension_numbers<[1], [0], [0], [1], [0, 0, 1, 1], [], []>} : vector<8x128xbf16>, vector<128x128xbf16>, vector<8x128xf32> -> vector<8x128xf32>
    %c0_3 = arith.constant 0 : index
    %c0_4 = arith.constant 0 : index
    %4 = vector.load %arg3[%c0_3, %c0_4] : memref<1x128xf32, #tpu.memory_space<vmem>>, vector<1x128xf32>
    %5 = vector.broadcast %4 : vector<1x128xf32> to vector<8x128xf32>
    %6 = arith.addf %3, %5 : vector<8x128xf32>
    %cst_5 = arith.constant 0.000000e+00 : f32
    %7 = vector.broadcast %cst_5 : f32 to vector<8x128xf32>
    %8 = arith.maximumf %6, %7 : vector<8x128xf32>
    %9 = arith.truncf %8 : vector<8x128xf32> to vector<8x128xbf16>
    %c0_6 = arith.constant 0 : index
    %c0_7 = arith.constant 0 : index
    %10 = vector.load %arg4[%c0_6, %c0_7] : memref<128x128xbf16, #tpu.memory_space<vmem>>, vector<128x128xbf16>
    %cst_8 = arith.constant dense<0.000000e+00> : vector<8x128xf32>
    %11 = tpu.matmul %9, %10, %cst_8 {dimension_numbers = #tpu.dot_dimension_numbers<[1], [0], [0], [1], [0, 0, 1, 1], [], []>} : vector<8x128xbf16>, vector<128x128xbf16>, vector<8x128xf32> -> vector<8x128xf32>
    %c0_9 = arith.constant 0 : index
    %c0_10 = arith.constant 0 : index
    %12 = vector.load %arg5[%c0_9, %c0_10] : memref<1x128xf32, #tpu.memory_space<vmem>>, vector<1x128xf32>
    %13 = vector.broadcast %12 : vector<1x128xf32> to vector<8x128xf32>
    %14 = arith.addf %11, %13 : vector<8x128xf32>
    %cst_11 = arith.constant 0.000000e+00 : f32
    %15 = vector.broadcast %cst_11 : f32 to vector<8x128xf32>
    %16 = arith.maximumf %14, %15 : vector<8x128xf32>
    %17 = arith.truncf %16 : vector<8x128xf32> to vector<8x128xbf16>
    %c0_12 = arith.constant 0 : index
    %c0_13 = arith.constant 0 : index
    %18 = vector.load %arg6[%c0_12, %c0_13] : memref<128x128xbf16, #tpu.memory_space<vmem>>, vector<128x128xbf16>
    %cst_14 = arith.constant dense<0.000000e+00> : vector<8x128xf32>
    %19 = tpu.matmul %17, %18, %cst_14 {dimension_numbers = #tpu.dot_dimension_numbers<[1], [0], [0], [1], [0, 0, 1, 1], [], []>} : vector<8x128xbf16>, vector<128x128xbf16>, vector<8x128xf32> -> vector<8x128xf32>
    %c0_15 = arith.constant 0 : index
    %c0_16 = arith.constant 0 : index
    %20 = vector.load %arg7[%c0_15, %c0_16] : memref<1x128xf32, #tpu.memory_space<vmem>>, vector<1x128xf32>
    %21 = vector.broadcast %20 : vector<1x128xf32> to vector<8x128xf32>
    %22 = arith.addf %19, %21 : vector<8x128xf32>
    %c0_17 = arith.constant 0 : index
    %c0_18 = arith.constant 0 : index
    %23 = vector.load %arg8[%c0_17, %c0_18] : memref<8x128xf32, #tpu.memory_space<vmem>>, vector<8x128xf32>
    tpu.vector_store %arg8[%c0_17, %c0_18], %22 {strides = array<i32>} : memref<8x128xf32, #tpu.memory_space<vmem>>, vector<8x128xf32>,
    return
  }
  func.func @transform_0(%arg0: i32) -> (i32, i32) {
    %c0_i32 = arith.constant 0 : i32
    %c0_i32_0 = arith.constant 0 : i32
    return %arg0, %c0_i32 : i32, i32
  }
  func.func @transform_1(%arg0: i32) -> (i32, i32) {
    %c0_i32 = arith.constant 0 : i32
    %c0_i32_0 = arith.constant 0 : i32
    %c0_i32_1 = arith.constant 0 : i32
    return %c0_i32, %c0_i32_0 : i32, i32
  }
  func.func @transform_2(%arg0: i32) -> (i32, i32) {
    %c0_i32 = arith.constant 0 : i32
    %c0_i32_0 = arith.constant 0 : i32
    %c0_i32_1 = arith.constant 0 : i32
    return %c0_i32, %c0_i32_0 : i32, i32
  }
  func.func @transform_3(%arg0: i32) -> (i32, i32) {
    %c0_i32 = arith.constant 0 : i32
    %c0_i32_0 = arith.constant 0 : i32
    %c0_i32_1 = arith.constant 0 : i32
    return %c0_i32, %c0_i32_0 : i32, i32
  }
  func.func @transform_4(%arg0: i32) -> (i32, i32) {
    %c0_i32 = arith.constant 0 : i32
    %c0_i32_0 = arith.constant 0 : i32
    %c0_i32_1 = arith.constant 0 : i32
    return %c0_i32, %c0_i32_0 : i32, i32
  }
  func.func @transform_5(%arg0: i32) -> (i32, i32) {
    %c0_i32 = arith.constant 0 : i32
    %c0_i32_0 = arith.constant 0 : i32
    %c0_i32_1 = arith.constant 0 : i32
    return %c0_i32, %c0_i32_0 : i32, i32
  }
  func.func @transform_6(%arg0: i32) -> (i32, i32) {
    %c0_i32 = arith.constant 0 : i32
    %c0_i32_0 = arith.constant 0 : i32
    %c0_i32_1 = arith.constant 0 : i32
    return %c0_i32, %c0_i32_0 : i32, i32
  }
  func.func @transform_7(%arg0: i32) -> (i32, i32) {
    %c0_i32 = arith.constant 0 : i32
    %c0_i32_0 = arith.constant 0 : i32
    return %arg0, %c0_i32 : i32, i32
  }
}

module attributes {stable_mosaic.version = 11 : i64} {
  func.func @_mlp_fused_kernel(%arg0: i32, %arg1: memref<8x128xf32, #tpu.memory_space<vmem>>, %arg2: memref<128x128xbf16, #tpu.memory_space<vmem>>, %arg3: memref<1x128xf32, #tpu.memory_space<vmem>>, %arg4: memref<128x128xbf16, #tpu.memory_space<vmem>>, %arg5: memref<1x128xf32, #tpu.memory_space<vmem>>, %arg6: memref<128x128xbf16, #tpu.memory_space<vmem>>, %arg7: memref<1x128xf32, #tpu.memory_space<vmem>>, %arg8: memref<8x128xf32, #tpu.memory_space<vmem>>) attributes {dimension_semantics = [#tpu.dimension_semantics<parallel>], iteration_bounds = array<i64: 2>, scalar_prefetch = 0 : i64, scratch_operands = 0 : i64, tpu.core_type = #tpu.core_type<tc>, window_params = [{transform_indices = @transform_0, window_bounds = array<i64: 8, 128>}, {pipeline_mode = #tpu.pipeline_mode<synchronous>, transform_indices = @transform_1, window_bounds = array<i64: 128, 128>}, {pipeline_mode = #tpu.pipeline_mode<synchronous>, transform_indices = @transform_2, window_bounds = array<i64: 1, 128>}, {pipeline_mode = #tpu.pipeline_mode<synchronous>, transform_indices = @transform_3, window_bounds = array<i64: 128, 128>}, {pipeline_mode = #tpu.pipeline_mode<synchronous>, transform_indices = @transform_4, window_bounds = array<i64: 1, 128>}, {pipeline_mode = #tpu.pipeline_mode<synchronous>, transform_indices = @transform_5, window_bounds = array<i64: 128, 128>}, {pipeline_mode = #tpu.pipeline_mode<synchronous>, transform_indices = @transform_6, window_bounds = array<i64: 1, 128>}, {transform_indices = @transform_7, window_bounds = array<i64: 8, 128>}]} {
    %c0 = arith.constant 0 : index
    %c0_0 = arith.constant 0 : index
    %0 = vector.load %arg1[%c0, %c0_0] : memref<8x128xf32, #tpu.memory_space<vmem>>, vector<8x128xf32>
    %1 = arith.truncf %0 : vector<8x128xf32> to vector<8x128xbf16>
    %c0_1 = arith.constant 0 : index
    %c0_2 = arith.constant 0 : index
    %2 = vector.load %arg2[%c0_1, %c0_2] : memref<128x128xbf16, #tpu.memory_space<vmem>>, vector<128x128xbf16>
    %cst = arith.constant dense<0.000000e+00> : vector<8x128xf32>
    %3 = tpu.matmul %1, %2, %cst {dimension_numbers = #tpu.dot_dimension_numbers<[1], [0], [0], [1], [0, 0, 1, 1], [], []>} : vector<8x128xbf16>, vector<128x128xbf16>, vector<8x128xf32> -> vector<8x128xf32>
    %c0_3 = arith.constant 0 : index
    %c0_4 = arith.constant 0 : index
    %4 = vector.load %arg3[%c0_3, %c0_4] : memref<1x128xf32, #tpu.memory_space<vmem>>, vector<1x128xf32>
    %5 = vector.broadcast %4 : vector<1x128xf32> to vector<8x128xf32>
    %6 = arith.addf %3, %5 : vector<8x128xf32>
    %cst_5 = arith.constant 0.000000e+00 : f32
    %7 = vector.broadcast %cst_5 : f32 to vector<8x128xf32>
    %8 = arith.maximumf %6, %7 : vector<8x128xf32>
    %9 = arith.truncf %8 : vector<8x128xf32> to vector<8x128xbf16>
    %c0_6 = arith.constant 0 : index
    %c0_7 = arith.constant 0 : index
    %10 = vector.load %arg4[%c0_6, %c0_7] : memref<128x128xbf16, #tpu.memory_space<vmem>>, vector<128x128xbf16>
    %cst_8 = arith.constant dense<0.000000e+00> : vector<8x128xf32>
    %11 = tpu.matmul %9, %10, %cst_8 {dimension_numbers = #tpu.dot_dimension_numbers<[1], [0], [0], [1], [0, 0, 1, 1], [], []>} : vector<8x128xbf16>, vector<128x128xbf16>, vector<8x128xf32> -> vector<8x128xf32>
    %c0_9 = arith.constant 0 : index
    %c0_10 = arith.constant 0 : index
    %12 = vector.load %arg5[%c0_9, %c0_10] : memref<1x128xf32, #tpu.memory_space<vmem>>, vector<1x128xf32>
    %13 = vector.broadcast %12 : vector<1x128xf32> to vector<8x128xf32>
    %14 = arith.addf %11, %13 : vector<8x128xf32>
    %cst_11 = arith.constant 0.000000e+00 : f32
    %15 = vector.broadcast %cst_11 : f32 to vector<8x128xf32>
    %16 = arith.maximumf %14, %15 : vector<8x128xf32>
    %17 = arith.truncf %16 : vector<8x128xf32> to vector<8x128xbf16>
    %c0_12 = arith.constant 0 : index
    %c0_13 = arith.constant 0 : index
    %18 = vector.load %arg6[%c0_12, %c0_13] : memref<128x128xbf16, #tpu.memory_space<vmem>>, vector<128x128xbf16>
    %cst_14 = arith.constant dense<0.000000e+00> : vector<8x128xf32>
    %19 = tpu.matmul %17, %18, %cst_14 {dimension_numbers = #tpu.dot_dimension_numbers<[1], [0], [0], [1], [0, 0, 1, 1], [], []>} : vector<8x128xbf16>, vector<128x128xbf16>, vector<8x128xf32> -> vector<8x128xf32>
    %c0_15 = arith.constant 0 : index
    %c0_16 = arith.constant 0 : index
    %20 = vector.load %arg7[%c0_15, %c0_16] : memref<1x128xf32, #tpu.memory_space<vmem>>, vector<1x128xf32>
    %21 = vector.broadcast %20 : vector<1x128xf32> to vector<8x128xf32>
    %22 = arith.addf %19, %21 : vector<8x128xf32>
    %c0_17 = arith.constant 0 : index
    %c0_18 = arith.constant 0 : index
    %23 = vector.load %arg8[%c0_17, %c0_18] : memref<8x128xf32, #tpu.memory_space<vmem>>, vector<8x128xf32>
    tpu.vector_store %arg8[%c0_17, %c0_18], %22 {strides = array<i32>} : memref<8x128xf32, #tpu.memory_space<vmem>>, vector<8x128xf32>,
    return
  }
  func.func @transform_0(%arg0: i32) -> (i32, i32) {
    %c0_i32 = arith.constant 0 : i32
    %c0_i32_0 = arith.constant 0 : i32
    return %arg0, %c0_i32 : i32, i32
  }
  func.func @transform_1(%arg0: i32) -> (i32, i32) {
    %c0_i32 = arith.constant 0 : i32
    %c0_i32_0 = arith.constant 0 : i32
    %c0_i32_1 = arith.constant 0 : i32
    return %c0_i32, %c0_i32_0 : i32, i32
  }
  func.func @transform_2(%arg0: i32) -> (i32, i32) {
    %c0_i32 = arith.constant 0 : i32
    %c0_i32_0 = arith.constant 0 : i32
    %c0_i32_1 = arith.constant 0 : i32
    return %c0_i32, %c0_i32_0 : i32, i32
  }
  func.func @transform_3(%arg0: i32) -> (i32, i32) {
    %c0_i32 = arith.constant 0 : i32
    %c0_i32_0 = arith.constant 0 : i32
    %c0_i32_1 = arith.constant 0 : i32
    return %c0_i32, %c0_i32_0 : i32, i32
  }
  func.func @transform_4(%arg0: i32) -> (i32, i32) {
    %c0_i32 = arith.constant 0 : i32
    %c0_i32_0 = arith.constant 0 : i32
    %c0_i32_1 = arith.constant 0 : i32
    return %c0_i32, %c0_i32_0 : i32, i32
  }
  func.func @transform_5(%arg0: i32) -> (i32, i32) {
    %c0_i32 = arith.constant 0 : i32
    %c0_i32_0 = arith.constant 0 : i32
    %c0_i32_1 = arith.constant 0 : i32
    return %c0_i32, %c0_i32_0 : i32, i32
  }
  func.func @transform_6(%arg0: i32) -> (i32, i32) {
    %c0_i32 = arith.constant 0 : i32
    %c0_i32_0 = arith.constant 0 : i32
    %c0_i32_1 = arith.constant 0 : i32
    return %c0_i32, %c0_i32_0 : i32, i32
  }
  func.func @transform_7(%arg0: i32) -> (i32, i32) {
    %c0_i32 = arith.constant 0 : i32
    %c0_i32_0 = arith.constant 0 : i32
    return %arg0, %c0_i32 : i32, i32
  }
}

</mosaic_0001>

<bundles_post_ra>
// kernel: tpu_custom_call.1
= control target key start
LH: loop header
LB: loop body
LE: loop exit
PB: predicated region body
PF: predicated region fallthrough
CT: control target
= control target key end

     0   :  { %s1344_s0 = inlined_call_operand.hbm [shape: f32[16,128], index: 0, kind: input, shape index: {}]   ;;  %s1345_s1 = inlined_call_operand.hbm [shape: bf16[128,128], index: 1, kind: input, shape index: {}]   ;;  %s1346_s2 = inlined_call_operand.vmem [shape: f32[1,128], index: 2, kind: input, shape index: {}]   ;;  %s1347_s3 = inlined_call_operand.hbm [shape: bf16[128,128], index: 3, kind: input, shape index: {}]   ;;  %s1348_s4 = inlined_call_operand.vmem [shape: f32[1,128], index: 4, kind: input, shape index: {}]   ;;  %s1349_s5 = inlined_call_operand.hbm [shape: bf16[128,128], index: 5, kind: input, shape index: {}]   ;;  %s1350_s6 = inlined_call_operand.vmem [shape: f32[1,128], index: 6, kind: input, shape index: {}]   ;;  %s1351_s7 = inlined_call_operand.hbm [shape: f32[16,128], index: 7, kind: output, shape index: {}]  }
   0x1   :  { %1352 = sst [smem:[#allocation15_spill]] %s1345_s1 }
   0x2   :  { %12 = vsyncpa [#allocation3], 0 }
   0x3   :  { %14 = vsyncpa [#allocation3 + $0x1], 0 }
   0x4   :  { %15 = vsyncpa [#allocation6], 0 }
   0x5   :  { %16 = vsyncpa [#allocation9], 0 }
   0x6   :  { %17 = vsyncpa [#allocation4], 0 }
   0x7   :  { %19 = vsyncpa [#allocation4 + $0x1], 0  ;;  %s1172_s24 = smov 0   ;;  %s1174_s25 = smov 0  }
   0x8   :  { %s1176_s26 = smov 0   ;;  %s1178_s27 = smov 0  }
   0x9 LB: > { %s1353_s1 = sld [smem:[#allocation15_spill]]  ;;  %s1196_s8 = sadd.s32 4294967295, %s1125_s27   ;;  %s1125_s27 = sphi %s1178_s27, %s1364_s27   ;;  %s1121_s26 = sphi %s1176_s26, %s1363_s26   ;;  %s1117_s25 = sphi %s1174_s25, %s1362_s25   ;;  %s1113_s24 = sphi %s1172_s24, %s1361_s24  }
   0xa   : > { %p712_p0 = scmp.ge.s32.totalorder %s1125_s27, 1  ;;  %p46_p1 = scmp.eq.s32.totalorder %s1196_s8, 0 }
   0xb   : > { %p208_p2 = scmp.lt.s32.totalorder %s1125_s27, 3  ;;  %s1127_s10 = smov [#allocation5]  }
   0xc   : > { %s221_s11 = sshll.u32 %s1127_s10, 4  ;;  %s236_s14 = sshll.u32 %s1347_s3, 4  ;;  %s222_s11 = int_to_ptr.vmem [resolvable:$true] %s221_s11  ;;  %s237_s14 = int_to_ptr.hbm [resolvable:$true] %s236_s14 }
   0xd   : > { %p1201_p3 = pnand %p712_p0, %p208_p2  ;;  %s253_s18 = sshll.u32 %s1349_s5, 4  ;;  %s254_s18 = int_to_ptr.hbm [resolvable:$true] %s253_s18 }
   0xe   : > { %s1128_s19 = smov [#allocation7]   ;;  %s1129_s21 = smov 64  }
   0xf   : > { %s219_s30 = sshll.u32 %s1353_s1, 4  ;;  %p865_p4 = pneg %p1201_p3  ;;  %s220_s30 = int_to_ptr.hbm [resolvable:$true] %s219_s30 }
  0x10   : > { %s238_s20 = sshll.u32 %s1128_s19, 4  ;;  %s1130_s22 = smov 4   ;;  %s239_s20 = int_to_ptr.vmem [resolvable:$true] %s238_s20 }
  0x11   : > { %p1213_p6 = pnand %p865_p4, %p46_p1  ;;  %s1131_s23 = smov [#allocation8]  }
  0x12   : > { %s255_s28 = sshll.u32 %s1131_s23, 4  ;;  %s711_s29 = sadd.s32 4294967294, %s1125_s27   ;;  %s256_s28 = int_to_ptr.vmem [resolvable:$true] %s255_s28 }
  0x13   : > { %868 = dma.hbm_to_vmem [thread:$0]  (!%p1213_p6), %s220_s30, 1024, %s222_s11, [#allocation6], %s1129_s21, %s1129_s21, %s1130_s22  }
  0x14   : > { %871 = dma.hbm_to_vmem [thread:$0]  (!%p1213_p6), %s237_s14, 1024, %s239_s20, [#allocation6], %s1129_s21, %s1129_s21, %s1130_s22  }
  0x15   : > { %874 = dma.hbm_to_vmem [thread:$0]  (!%p1213_p6), %s254_s18, 1024, %s256_s28, [#allocation9], %s1129_s21, %s1129_s21, %s1130_s22  }
  0x16   : > { %s1228_s10 = sadd.s32 1, %s1125_s27   ;;  %s32_s12 = sadd.s32 1, %s1121_s26 }
  0x17   : > { %s29_s30 = ssub.s32 %s1125_s27, %s1228_s10  ;;  %p39_p7 = scmp.ne.s32.totalorder %s1121_s26, %s1117_s25 }
  0x18   : > { %p30_p8 = scmp.eq.s32.totalorder %s29_s30, 0  ;;  %p40_p9 = scmp.eq.s32.totalorder %s1125_s27, 0 }
  0x19   : > { %p45_p10 = scmp.ne.s32.totalorder %s1117_s25, %s1113_s24  ;;  %p195_p11 = scmp.eq.s32.totalorder %s1196_s8, 1 }
  0x1a   : > { %s1240_s11 = scalar_select %p30_p8, %s1121_s26, %s32_s12  }
  0x1b   : > { %p1244_p12 = por %p46_p1, %p45_p10  ;;  %p1248_p13 = por %p195_p11, %p39_p7 }
  0x1c   : > { %p201_p0 = scmp.eq.s32.totalorder %s711_s29, 1  ;;  %p41_p2 = por %p40_p9, %p39_p7 }
  0x1d   : > { %s272_s15 = sand.u32 1, %s1121_s26   ;;  %p886_p6 = scmp.lt.s32.totalorder %s1125_s27, 2 }
  0x1e   : > { %p1253_p4 = por %p201_p0, %p45_p10  ;;  %s717_s17 = sshll.u32 %s272_s15, 3 }
  0x1f   : > { %s718_s18 = sshll.u32 %s1125_s27, 3  ;;  %s276_s23 = scalar_lea.vmem [#allocation2], %s717_s17 }
  0x20   : > { %s280_s21 = scalar_lea.hbm %s1344_s0, %s718_s18  ;;  %s284_s28 = sshll.u32 %s276_s23, 4  ;;  %s285_s28 = int_to_ptr.vmem [resolvable:$true] %s284_s28 }
  0x21   : > { %s282_s22 = sshll.u32 %s280_s21, 4  ;;  %p1262_p8 = pnand %p886_p6, %p41_p2  ;;  %s283_s22 = int_to_ptr.hbm [resolvable:$true] %s282_s22 }
  0x22   : > { %s273_s12 = scalar_lea.sflag [#allocation3], %s272_s15  ;;  %s1021_s30 = sshra.s32 %s283_s22, 4  ;;  %s1022_s30 = int_to_ptr.hbm [resolvable:$true] %s1021_s30 }
  0x23   : > { %s1023_s1 = scalar_lea.hbm %s1022_s30, 8  ;;  %p1025_p9 = pneg %p1262_p8 }
  0x24   : > { %p1024_p7 = scmp.ne.s32.totalorder %s1022_s30, %s1023_s1  ;;  %s1028_s17 = scalar_lea.hbm %s1344_s0, 16 }
  0x25   : > { %p1029_p0 = scmp.lt.s32.totalorder %s1022_s30, %s1344_s0  ;;  %p1030_p2 = scmp.lt.s32.totalorder %s1028_s17, %s1023_s1 }
  0x26   : > { %p1026_p10 = pnand %p1025_p9, %p1024_p7 }
  0x27   : > { %p1031_p6 = por %p1030_p2, %p1029_p0 }
  0x28   : > { %p1027_p11 = pneg %p1026_p10 }
  0x2a   : > { %p1032_p5 = pnand %p1031_p6, %p1027_p11 }
  0x2c   : > { %1035 = shalt.err (!%p1032_p5)
}
  0x2d   : > { %878 = dma.hbm_to_vmem [thread:$0]  (!%p1262_p8), %s283_s22, 128, %s285_s28, %s273_s12  }
  0x2e   : > { %293 = sbr.rel (%p1201_p3) target bundleno = 492 (0x1ec), region = 48  ;;  %s1279_s15 = sand.u32 (!%p1201_p3), 1, %s1117_s25  }
  0x2f   : > { %s720_s23 = sshll.u32 (!%p1201_p3), %s1279_s15, 3  ;;  %s296_s18 = scalar_lea.sflag (!%p1201_p3), [#allocation3], %s1279_s15 }
  0x30   : > { %s1285_s1 = scalar_lea.vmem (!%p1201_p3), [#allocation2], %s720_s23 }
  0x33   : > { %1096 = dma.done.wait (%p1244_p12), %s296_s18, 128  }
  0x34   : > { %1098 = vsyncadd (%p1244_p12), %s296_s18, 4294967168 }
  0x35   : > { %1100 = dma.done.wait (%p46_p1), [#allocation6], 2048  }
  0x36   : > { %1102 = vsyncadd (%p46_p1), [#allocation6], 4294965248 }
  0x37   : > { %1104 = dma.done.wait (%p46_p1), [#allocation9], 1024  }
  0x38   : > { %1106 = vsyncadd (%p46_p1), [#allocation9], 4294966272  ;;  %v832_v0 = vld [vmem:[#allocation5 + $0x38] sm:$0xff]  ;;  %v831_v1 = vld [vmem:[#allocation5 + $0x30] sm:$0xff]  ;;  %s822_s29 = sshll.u32 %s1196_s8, 3  ;;  %s345_s21 = scalar_lea.vmem [#allocation10], %s720_s23 }
  0x39   : > { %416 = vmatpush.bf16.msra.mxu0 %v832_v0  ;;  %v840_v2 = vld [vmem:[#allocation7 + $0x38] sm:$0xff]  ;;  %v839_v3 = vld [vmem:[#allocation7 + $0x30] sm:$0xff]  ;;  %v830_v4 = vld [vmem:[#allocation5 + $0x28] sm:$0xff]  ;;  %s607_s19 = scalar_lea.hbm %s1351_s7, %s822_s29  ;;  %s609_s18 = sshll.u32 %s345_s21, 4  ;;  %s610_s18 = int_to_ptr.vmem [resolvable:$true] %s609_s18 }
  0x3a   : > { %499 = vmatpush.bf16.msra.mxu1 %v840_v2  ;;  %v838_v5 = vld [vmem:[#allocation7 + $0x28] sm:$0xff]  ;;  %v829_v6 = vld [vmem:[#allocation5 + $0x20] sm:$0xff]  ;;  %v828_v8 = vld [vmem:[#allocation5 + $0x18] sm:$0xff]  ;;  %s597_s9 = scalar_lea.sflag [#allocation4], %s1279_s15  ;;  %s1071_s29 = scalar_lea.hbm %s1351_s7, 16 }
  0x3b   : > { %v837_v7 = vld [vmem:[#allocation7 + $0x20] sm:$0xff]  ;;  %v836_v9 = vld [vmem:[#allocation7 + $0x18] sm:$0xff]  ;;  %v827_v10 = vld [vmem:[#allocation5 + $0x10] sm:$0xff] }
  0x3c   : > { %v835_v11 = vld [vmem:[#allocation7 + $0x10] sm:$0xff]  ;;  %v826_v12 = vld [vmem:[#allocation5 + $0x8] sm:$0xff]  ;;  %v825_v13 = vld [vmem:[#allocation5] sm:$0xff] }
  0x3d   : > { %417 = vmatpush.bf16.msra.mxu0 %v831_v1  ;;  %v346_v14 = vld [vmem:[%s1285_s1] sm:$0xff]  ;;  %v834_v16 = vld [vmem:[#allocation7 + $0x8] sm:$0xff]  ;;  %v833_v17 = vld [vmem:[#allocation7] sm:$0xff]  ;;  %s611_s1 = sshll.u32 %s607_s19, 4  ;;  %s612_s1 = int_to_ptr.hbm [resolvable:$true] %s611_s1 }
  0x3e   : > { %500 = vmatpush.bf16.msra.mxu1 %v839_v3  ;;  %v347_v15 = vpack.c.bf16 %v346_v14, %v346_v14  ;;  %v848_v18 = vld [vmem:[#allocation8 + $0x38] sm:$0xff]  ;;  %v847_v19 = vld [vmem:[#allocation8 + $0x30] sm:$0xff]  ;;  %v846_v20 = vld [vmem:[#allocation8 + $0x28] sm:$0xff]  ;;  %s1065_s8 = sshra.s32 %s612_s1, 4  ;;  %s1066_s8 = int_to_ptr.hbm [resolvable:$true] %s1065_s8 }
  0x3f   : > { %582 = vmatpush.bf16.msra.mxu2 %v848_v18  ;;  %v845_v21 = vld [vmem:[#allocation8 + $0x20] sm:$0xff]  ;;  %v844_v22 = vld [vmem:[#allocation8 + $0x18] sm:$0xff]  ;;  %v843_v23 = vld [vmem:[#allocation8 + $0x10] sm:$0xff]  ;;  %s1067_s13 = scalar_lea.hbm %s1066_s8, 8  ;;  %p1072_p12 = scmp.lt.s32.totalorder %s1066_s8, %s1351_s7 }
  0x40   : > { %v928_v24 = vld [vmem:[%s1346_s2] ss:$0 sm:$0xff]  ;;  %v842_v30 = vld [vmem:[#allocation8 + $0x8] sm:$0xff]  ;;  %v841_v31 = vld [vmem:[#allocation8] sm:$0xff]  ;;  %p1068_p1 = scmp.ne.s32.totalorder %s1066_s8, %s1067_s13  ;;  %p1073_p8 = scmp.lt.s32.totalorder %s1071_s29, %s1067_s13 }
  0x41   : > { %418 = vmatpush.bf16.msra.mxu0 %v830_v4  ;;  %v929_v32 = vld [vmem:[%s1348_s4] ss:$0 sm:$0xff] }
  0x42   : > { %501 = vmatpush.bf16.msra.mxu1 %v838_v5  ;;  %v930_v38 = vld [vmem:[%s1350_s6] ss:$0 sm:$0xff]  ;;  %p1069_p3 = pnand %p1068_p1, %p1248_p13  ;;  %p1074_p7 = por %p1073_p8, %p1072_p12 }
  0x43   : > { %583 = vmatpush.bf16.msra.mxu2 %v847_v19 }
  0x44   : > { %p1070_p5 = pneg %p1069_p3 }
  0x45   : > { %419 = vmatpush.bf16.msra.mxu0 %v829_v6 }
  0x46   : > { %502 = vmatpush.bf16.msra.mxu1 %v837_v7  ;;  %p1075_p9 = pnand %p1074_p7, %p1070_p5 }
  0x47   : > { %584 = vmatpush.bf16.msra.mxu2 %v846_v20 }
  0x49   : > { %420 = vmatpush.bf16.msra.mxu0 %v828_v8 }
  0x4a   : > { %503 = vmatpush.bf16.msra.mxu1 %v836_v9 }
  0x4b   : > { %585 = vmatpush.bf16.msra.mxu2 %v845_v21 }
  0x4d   : > { %421 = vmatpush.bf16.msra.mxu0 %v827_v10 }
  0x4e   : > { %504 = vmatpush.bf16.msra.mxu1 %v835_v11 }
  0x4f   : > { %586 = vmatpush.bf16.msra.mxu2 %v844_v22 }
  0x51   : > { %422 = vmatpush.bf16.msra.mxu0 %v826_v12 }
  0x52   : > { %505 = vmatpush.bf16.msra.mxu1 %v834_v16 }
  0x53   : > { %587 = vmatpush.bf16.msra.mxu2 %v843_v23 }
  0x55   : > { %423 = vmatpush.bf16.msra.mxu0 %v825_v13 }
  0x56   : > { %506 = vmatpush.bf16.msra.mxu1 %v833_v17 }
  0x57   : > { %588 = vmatpush.bf16.msra.mxu2 %v842_v30 }
  0x58   : > { %424 = vmatmul.bf16.vlgmr.msra.gmra.mxu0 %v347_v15 }
  0x5b   : > { %589 = vmatpush.bf16.msra.mxu2 %v841_v31 }
  0xd5   : > { %v425_v25 = vpop.f32.mrf.mxu0 }
  0xd6   : > { %v426_v26 = vadd.f32 %v928_v24, %v425_v25 }
  0xd8   : > { %v429_v27 = vmax.f32 %v426_v26, 0.0 }
  0xda   : > { %v430_v28 = vpack.c.bf16 %v429_v27, %v429_v27 }
  0xdc   : > { %507 = vmatmul.bf16.vlgmr.msra.gmra.mxu1 %v430_v28 }
  0xdd   : > { %v427_v29 = vpop.f32.mrf.mxu0 }
 0x159   : > { %v508_v33 = vpop.f32.mrf.mxu1 }
 0x15a   : > { %v509_v34 = vadd.f32 %v929_v32, %v508_v33 }
 0x15c   : > { %v512_v35 = vmax.f32 %v509_v34, 0.0 }
 0x15e   : > { %v513_v36 = vpack.c.bf16 %v512_v35, %v512_v35 }
 0x160   : > { %590 = vmatmul.bf16.vlgmr.msra.gmra.mxu2 %v513_v36 }
 0x161   : > { %v510_v37 = vpop.f32.mrf.mxu1 }
 0x1e3   : > { %v591_v39 = vpop.f32.mrf.mxu2 }
 0x1e4   : > { %v592_v40 = vadd.f32 %v930_v38, %v591_v39 }
 0x1e6   : > { %595 = vst [vmem:[%s345_s21] sm:$0xff] %v592_v40 }
 0x1e7   : > { %1078 = shalt.err (!%p1075_p9)
}
 0x1e8   : > { %863 = dma.vmem_to_hbm [thread:$0]  (%p1248_p13), %s610_s18, 128, %s612_s1, %s597_s9  }
 0x1eb   : > { %v593_v41 = vpop.f32.mrf.mxu2 }
 0x1ec PF: > { %s623_s15 = sand.u32 1, %s1113_s24   ;;  %p1360_p10 = scmp.ge.s32.totalorder %s1125_s27, 2 }
 0x1ed   : > { %s624_s30 = scalar_lea.sflag [#allocation4], %s623_s15 }
 0x1ee   : > { %p880_p11 = pnand %p1360_p10, %p1253_p4 }
 0x1f0   : > { %p881_p0 = pneg %p880_p11 }
 0x1f2   : > { %1108 = dma.done.wait (%p881_p0), %s624_s30, 128  }
 0x1f3   : > { %1110 = vsyncadd (%p881_p0), %s624_s30, 4294967168  ;;  %p22_p2 = scmp.ge.s32.totalorder %s1228_s10, 4   ;;  %s1361_s24 = smov %s1117_s25 }
 0x1f4   : > { %s1362_s25 = smov %s1121_s26  ;;  %s1363_s26 = smov %s1240_s11 }
 0x1f5   : > { %s1364_s27 = smov %s1228_s10  ;;  %24 = sbr.rel (!%p22_p2) target bundleno = 9 (0x9), region = 105 }
 0x1fa   :  { %630 = vsyncpa [#allocation3], 1 }
 0x1fb   :  { %632 = vsyncpa [#allocation3 + $0x1], 1 }
 0x1fc   :  { %633 = vsyncpa [#allocation6], 1 }
 0x1fd   :  { %634 = vsyncpa [#allocation9], 1 }
 0x1fe   :  { %635 = vsyncpa [#allocation4], 1 }
 0x1ff   :  { %637 = vsyncpa [#allocation4 + $0x1], 1 }

// kernel: tpu_custom_call.1
= control target key start
LH: loop header
LB: loop body
LE: loop exit
PB: predicated region body
PF: predicated region fallthrough
CT: control target
= control target key end

     0   :  { %s1344_s0 = inlined_call_operand.hbm [shape: f32[16,128], index: 0, kind: input, shape index: {}]   ;;  %s1345_s1 = inlined_call_operand.hbm [shape: bf16[128,128], index: 1, kind: input, shape index: {}]   ;;  %s1346_s2 = inlined_call_operand.vmem [shape: f32[1,128], index: 2, kind: input, shape index: {}]   ;;  %s1347_s3 = inlined_call_operand.hbm [shape: bf16[128,128], index: 3, kind: input, shape index: {}]   ;;  %s1348_s4 = inlined_call_operand.vmem [shape: f32[1,128], index: 4, kind: input, shape index: {}]   ;;  %s1349_s5 = inlined_call_operand.hbm [shape: bf16[128,128], index: 5, kind: input, shape index: {}]   ;;  %s1350_s6 = inlined_call_operand.vmem [shape: f32[1,128], index: 6, kind: input, shape index: {}]   ;;  %s1351_s7 = inlined_call_operand.hbm [shape: f32[16,128], index: 7, kind: output, shape index: {}]  }
   0x1   :  { %1352 = sst [smem:[#allocation15_spill]] %s1345_s1 }
   0x2   :  { %12 = vsyncpa [#allocation3], 0 }
   0x3   :  { %14 = vsyncpa [#allocation3 + $0x1], 0 }
   0x4   :  { %15 = vsyncpa [#allocation6], 0 }
   0x5   :  { %16 = vsyncpa [#allocation9], 0 }
   0x6   :  { %17 = vsyncpa [#allocation4], 0 }
   0x7   :  { %19 = vsyncpa [#allocation4 + $0x1], 0  ;;  %s1172_s24 = smov 0   ;;  %s1174_s25 = smov 0  }
   0x8   :  { %s1176_s26 = smov 0   ;;  %s1178_s27 = smov 0  }
   0x9 LB: > { %s1353_s1 = sld [smem:[#allocation15_spill]]  ;;  %s1196_s8 = sadd.s32 4294967295, %s1125_s27   ;;  %s1125_s27 = sphi %s1178_s27, %s1364_s27   ;;  %s1121_s26 = sphi %s1176_s26, %s1363_s26   ;;  %s1117_s25 = sphi %s1174_s25, %s1362_s25   ;;  %s1113_s24 = sphi %s1172_s24, %s1361_s24  }
   0xa   : > { %p712_p0 = scmp.ge.s32.totalorder %s1125_s27, 1  ;;  %p46_p1 = scmp.eq.s32.totalorder %s1196_s8, 0 }
   0xb   : > { %p208_p2 = scmp.lt.s32.totalorder %s1125_s27, 3  ;;  %s1127_s10 = smov [#allocation5]  }
   0xc   : > { %s221_s11 = sshll.u32 %s1127_s10, 4  ;;  %s236_s14 = sshll.u32 %s1347_s3, 4  ;;  %s222_s11 = int_to_ptr.vmem [resolvable:$true] %s221_s11  ;;  %s237_s14 = int_to_ptr.hbm [resolvable:$true] %s236_s14 }
   0xd   : > { %p1201_p3 = pnand %p712_p0, %p208_p2  ;;  %s253_s18 = sshll.u32 %s1349_s5, 4  ;;  %s254_s18 = int_to_ptr.hbm [resolvable:$true] %s253_s18 }
   0xe   : > { %s1128_s19 = smov [#allocation7]   ;;  %s1129_s21 = smov 64  }
   0xf   : > { %s219_s30 = sshll.u32 %s1353_s1, 4  ;;  %p865_p4 = pneg %p1201_p3  ;;  %s220_s30 = int_to_ptr.hbm [resolvable:$true] %s219_s30 }
  0x10   : > { %s238_s20 = sshll.u32 %s1128_s19, 4  ;;  %s1130_s22 = smov 4   ;;  %s239_s20 = int_to_ptr.vmem [resolvable:$true] %s238_s20 }
  0x11   : > { %p1213_p6 = pnand %p865_p4, %p46_p1  ;;  %s1131_s23 = smov [#allocation8]  }
  0x12   : > { %s255_s28 = sshll.u32 %s1131_s23, 4  ;;  %s711_s29 = sadd.s32 4294967294, %s1125_s27   ;;  %s256_s28 = int_to_ptr.vmem [resolvable:$true] %s255_s28 }
  0x13   : > { %868 = dma.hbm_to_vmem [thread:$0]  (!%p1213_p6), %s220_s30, 1024, %s222_s11, [#allocation6], %s1129_s21, %s1129_s21, %s1130_s22  }
  0x14   : > { %871 = dma.hbm_to_vmem [thread:$0]  (!%p1213_p6), %s237_s14, 1024, %s239_s20, [#allocation6], %s1129_s21, %s1129_s21, %s1130_s22  }
  0x15   : > { %874 = dma.hbm_to_vmem [thread:$0]  (!%p1213_p6), %s254_s18, 1024, %s256_s28, [#allocation9], %s1129_s21, %s1129_s21, %s1130_s22  }
  0x16   : > { %s1228_s10 = sadd.s32 1, %s1125_s27   ;;  %s32_s12 = sadd.s32 1, %s1121_s26 }
  0x17   : > { %s29_s30 = ssub.s32 %s1125_s27, %s1228_s10  ;;  %p39_p7 = scmp.ne.s32.totalorder %s1121_s26, %s1117_s25 }
  0x18   : > { %p30_p8 = scmp.eq.s32.totalorder %s29_s30, 0  ;;  %p40_p9 = scmp.eq.s32.totalorder %s1125_s27, 0 }
  0x19   : > { %p45_p10 = scmp.ne.s32.totalorder %s1117_s25, %s1113_s24  ;;  %p195_p11 = scmp.eq.s32.totalorder %s1196_s8, 1 }
  0x1a   : > { %s1240_s11 = scalar_select %p30_p8, %s1121_s26, %s32_s12  }
  0x1b   : > { %p1244_p12 = por %p46_p1, %p45_p10  ;;  %p1248_p13 = por %p195_p11, %p39_p7 }
  0x1c   : > { %p201_p0 = scmp.eq.s32.totalorder %s711_s29, 1  ;;  %p41_p2 = por %p40_p9, %p39_p7 }
  0x1d   : > { %s272_s15 = sand.u32 1, %s1121_s26   ;;  %p886_p6 = scmp.lt.s32.totalorder %s1125_s27, 2 }
  0x1e   : > { %p1253_p4 = por %p201_p0, %p45_p10  ;;  %s717_s17 = sshll.u32 %s272_s15, 3 }
  0x1f   : > { %s718_s18 = sshll.u32 %s1125_s27, 3  ;;  %s276_s23 = scalar_lea.vmem [#allocation2], %s717_s17 }
  0x20   : > { %s280_s21 = scalar_lea.hbm %s1344_s0, %s718_s18  ;;  %s284_s28 = sshll.u32 %s276_s23, 4  ;;  %s285_s28 = int_to_ptr.vmem [resolvable:$true] %s284_s28 }
  0x21   : > { %s282_s22 = sshll.u32 %s280_s21, 4  ;;  %p1262_p8 = pnand %p886_p6, %p41_p2  ;;  %s283_s22 = int_to_ptr.hbm [resolvable:$true] %s282_s22 }
  0x22   : > { %s273_s12 = scalar_lea.sflag [#allocation3], %s272_s15  ;;  %s1021_s30 = sshra.s32 %s283_s22, 4  ;;  %s1022_s30 = int_to_ptr.hbm [resolvable:$true] %s1021_s30 }
  0x23   : > { %s1023_s1 = scalar_lea.hbm %s1022_s30, 8  ;;  %p1025_p9 = pneg %p1262_p8 }
  0x24   : > { %p1024_p7 = scmp.ne.s32.totalorder %s1022_s30, %s1023_s1  ;;  %s1028_s17 = scalar_lea.hbm %s1344_s0, 16 }
  0x25   : > { %p1029_p0 = scmp.lt.s32.totalorder %s1022_s30, %s1344_s0  ;;  %p1030_p2 = scmp.lt.s32.totalorder %s1028_s17, %s1023_s1 }
  0x26   : > { %p1026_p10 = pnand %p1025_p9, %p1024_p7 }
  0x27   : > { %p1031_p6 = por %p1030_p2, %p1029_p0 }
  0x28   : > { %p1027_p11 = pneg %p1026_p10 }
  0x2a   : > { %p1032_p5 = pnand %p1031_p6, %p1027_p11 }
  0x2c   : > { %1035 = shalt.err (!%p1032_p5)
}
  0x2d   : > { %878 = dma.hbm_to_vmem [thread:$0]  (!%p1262_p8), %s283_s22, 128, %s285_s28, %s273_s12  }
  0x2e   : > { %293 = sbr.rel (%p1201_p3) target bundleno = 492 (0x1ec), region = 48  ;;  %s1279_s15 = sand.u32 (!%p1201_p3), 1, %s1117_s25  }
  0x2f   : > { %s720_s23 = sshll.u32 (!%p1201_p3), %s1279_s15, 3  ;;  %s296_s18 = scalar_lea.sflag (!%p1201_p3), [#allocation3], %s1279_s15 }
  0x30   : > { %s1285_s1 = scalar_lea.vmem (!%p1201_p3), [#allocation2], %s720_s23 }
  0x33   : > { %1096 = dma.done.wait (%p1244_p12), %s296_s18, 128  }
  0x34   : > { %1098 = vsyncadd (%p1244_p12), %s296_s18, 4294967168 }
  0x35   : > { %1100 = dma.done.wait (%p46_p1), [#allocation6], 2048  }
  0x36   : > { %1102 = vsyncadd (%p46_p1), [#allocation6], 4294965248 }
  0x37   : > { %1104 = dma.done.wait (%p46_p1), [#allocation9], 1024  }
  0x38   : > { %1106 = vsyncadd (%p46_p1), [#allocation9], 4294966272  ;;  %v832_v0 = vld [vmem:[#allocation5 + $0x38] sm:$0xff]  ;;  %v831_v1 = vld [vmem:[#allocation5 + $0x30] sm:$0xff]  ;;  %s822_s29 = sshll.u32 %s1196_s8, 3  ;;  %s345_s21 = scalar_lea.vmem [#allocation10], %s720_s23 }
  0x39   : > { %416 = vmatpush.bf16.msra.mxu0 %v832_v0  ;;  %v840_v2 = vld [vmem:[#allocation7 + $0x38] sm:$0xff]  ;;  %v839_v3 = vld [vmem:[#allocation7 + $0x30] sm:$0xff]  ;;  %v830_v4 = vld [vmem:[#allocation5 + $0x28] sm:$0xff]  ;;  %s607_s19 = scalar_lea.hbm %s1351_s7, %s822_s29  ;;  %s609_s18 = sshll.u32 %s345_s21, 4  ;;  %s610_s18 = int_to_ptr.vmem [resolvable:$true] %s609_s18 }
  0x3a   : > { %499 = vmatpush.bf16.msra.mxu1 %v840_v2  ;;  %v838_v5 = vld [vmem:[#allocation7 + $0x28] sm:$0xff]  ;;  %v829_v6 = vld [vmem:[#allocation5 + $0x20] sm:$0xff]  ;;  %v828_v8 = vld [vmem:[#allocation5 + $0x18] sm:$0xff]  ;;  %s597_s9 = scalar_lea.sflag [#allocation4], %s1279_s15  ;;  %s1071_s29 = scalar_lea.hbm %s1351_s7, 16 }
  0x3b   : > { %v837_v7 = vld [vmem:[#allocation7 + $0x20] sm:$0xff]  ;;  %v836_v9 = vld [vmem:[#allocation7 + $0x18] sm:$0xff]  ;;  %v827_v10 = vld [vmem:[#allocation5 + $0x10] sm:$0xff] }
  0x3c   : > { %v835_v11 = vld [vmem:[#allocation7 + $0x10] sm:$0xff]  ;;  %v826_v12 = vld [vmem:[#allocation5 + $0x8] sm:$0xff]  ;;  %v825_v13 = vld [vmem:[#allocation5] sm:$0xff] }
  0x3d   : > { %417 = vmatpush.bf16.msra.mxu0 %v831_v1  ;;  %v346_v14 = vld [vmem:[%s1285_s1] sm:$0xff]  ;;  %v834_v16 = vld [vmem:[#allocation7 + $0x8] sm:$0xff]  ;;  %v833_v17 = vld [vmem:[#allocation7] sm:$0xff]  ;;  %s611_s1 = sshll.u32 %s607_s19, 4  ;;  %s612_s1 = int_to_ptr.hbm [resolvable:$true] %s611_s1 }
  0x3e   : > { %500 = vmatpush.bf16.msra.mxu1 %v839_v3  ;;  %v347_v15 = vpack.c.bf16 %v346_v14, %v346_v14  ;;  %v848_v18 = vld [vmem:[#allocation8 + $0x38] sm:$0xff]  ;;  %v847_v19 = vld [vmem:[#allocation8 + $0x30] sm:$0xff]  ;;  %v846_v20 = vld [vmem:[#allocation8 + $0x28] sm:$0xff]  ;;  %s1065_s8 = sshra.s32 %s612_s1, 4  ;;  %s1066_s8 = int_to_ptr.hbm [resolvable:$true] %s1065_s8 }
  0x3f   : > { %582 = vmatpush.bf16.msra.mxu2 %v848_v18  ;;  %v845_v21 = vld [vmem:[#allocation8 + $0x20] sm:$0xff]  ;;  %v844_v22 = vld [vmem:[#allocation8 + $0x18] sm:$0xff]  ;;  %v843_v23 = vld [vmem:[#allocation8 + $0x10] sm:$0xff]  ;;  %s1067_s13 = scalar_lea.hbm %s1066_s8, 8  ;;  %p1072_p12 = scmp.lt.s32.totalorder %s1066_s8, %s1351_s7 }
  0x40   : > { %v928_v24 = vld [vmem:[%s1346_s2] ss:$0 sm:$0xff]  ;;  %v842_v30 = vld [vmem:[#allocation8 + $0x8] sm:$0xff]  ;;  %v841_v31 = vld [vmem:[#allocation8] sm:$0xff]  ;;  %p1068_p1 = scmp.ne.s32.totalorder %s1066_s8, %s1067_s13  ;;  %p1073_p8 = scmp.lt.s32.totalorder %s1071_s29, %s1067_s13 }
  0x41   : > { %418 = vmatpush.bf16.msra.mxu0 %v830_v4  ;;  %v929_v32 = vld [vmem:[%s1348_s4] ss:$0 sm:$0xff] }
  0x42   : > { %501 = vmatpush.bf16.msra.mxu1 %v838_v5  ;;  %v930_v38 = vld [vmem:[%s1350_s6] ss:$0 sm:$0xff]  ;;  %p1069_p3 = pnand %p1068_p1, %p1248_p13  ;;  %p1074_p7 = por %p1073_p8, %p1072_p12 }
  0x43   : > { %583 = vmatpush.bf16.msra.mxu2 %v847_v19 }
  0x44   : > { %p1070_p5 = pneg %p1069_p3 }
  0x45   : > { %419 = vmatpush.bf16.msra.mxu0 %v829_v6 }
  0x46   : > { %502 = vmatpush.bf16.msra.mxu1 %v837_v7  ;;  %p1075_p9 = pnand %p1074_p7, %p1070_p5 }
  0x47   : > { %584 = vmatpush.bf16.msra.mxu2 %v846_v20 }
  0x49   : > { %420 = vmatpush.bf16.msra.mxu0 %v828_v8 }
  0x4a   : > { %503 = vmatpush.bf16.msra.mxu1 %v836_v9 }
  0x4b   : > { %585 = vmatpush.bf16.msra.mxu2 %v845_v21 }
  0x4d   : > { %421 = vmatpush.bf16.msra.mxu0 %v827_v10 }
  0x4e   : > { %504 = vmatpush.bf16.msra.mxu1 %v835_v11 }
  0x4f   : > { %586 = vmatpush.bf16.msra.mxu2 %v844_v22 }
  0x51   : > { %422 = vmatpush.bf16.msra.mxu0 %v826_v12 }
  0x52   : > { %505 = vmatpush.bf16.msra.mxu1 %v834_v16 }
  0x53   : > { %587 = vmatpush.bf16.msra.mxu2 %v843_v23 }
  0x55   : > { %423 = vmatpush.bf16.msra.mxu0 %v825_v13 }
  0x56   : > { %506 = vmatpush.bf16.msra.mxu1 %v833_v17 }
  0x57   : > { %588 = vmatpush.bf16.msra.mxu2 %v842_v30 }
  0x58   : > { %424 = vmatmul.bf16.vlgmr.msra.gmra.mxu0 %v347_v15 }
  0x5b   : > { %589 = vmatpush.bf16.msra.mxu2 %v841_v31 }
  0xd5   : > { %v425_v25 = vpop.f32.mrf.mxu0 }
  0xd6   : > { %v426_v26 = vadd.f32 %v928_v24, %v425_v25 }
  0xd8   : > { %v429_v27 = vmax.f32 %v426_v26, 0.0 }
  0xda   : > { %v430_v28 = vpack.c.bf16 %v429_v27, %v429_v27 }
  0xdc   : > { %507 = vmatmul.bf16.vlgmr.msra.gmra.mxu1 %v430_v28 }
  0xdd   : > { %v427_v29 = vpop.f32.mrf.mxu0 }
 0x159   : > { %v508_v33 = vpop.f32.mrf.mxu1 }
 0x15a   : > { %v509_v34 = vadd.f32 %v929_v32, %v508_v33 }
 0x15c   : > { %v512_v35 = vmax.f32 %v509_v34, 0.0 }
 0x15e   : > { %v513_v36 = vpack.c.bf16 %v512_v35, %v512_v35 }
 0x160   : > { %590 = vmatmul.bf16.vlgmr.msra.gmra.mxu2 %v513_v36 }
 0x161   : > { %v510_v37 = vpop.f32.mrf.mxu1 }
 0x1e3   : > { %v591_v39 = vpop.f32.mrf.mxu2 }
 0x1e4   : > { %v592_v40 = vadd.f32 %v930_v38, %v591_v39 }
 0x1e6   : > { %595 = vst [vmem:[%s345_s21] sm:$0xff] %v592_v40 }
 0x1e7   : > { %1078 = shalt.err (!%p1075_p9)
}
 0x1e8   : > { %863 = dma.vmem_to_hbm [thread:$0]  (%p1248_p13), %s610_s18, 128, %s612_s1, %s597_s9  }
 0x1eb   : > { %v593_v41 = vpop.f32.mrf.mxu2 }
 0x1ec PF: > { %s623_s15 = sand.u32 1, %s1113_s24   ;;  %p1360_p10 = scmp.ge.s32.totalorder %s1125_s27, 2 }
 0x1ed   : > { %s624_s30 = scalar_lea.sflag [#allocation4], %s623_s15 }
 0x1ee   : > { %p880_p11 = pnand %p1360_p10, %p1253_p4 }
 0x1f0   : > { %p881_p0 = pneg %p880_p11 }
 0x1f2   : > { %1108 = dma.done.wait (%p881_p0), %s624_s30, 128  }
 0x1f3   : > { %1110 = vsyncadd (%p881_p0), %s624_s30, 4294967168  ;;  %p22_p2 = scmp.ge.s32.totalorder %s1228_s10, 4   ;;  %s1361_s24 = smov %s1117_s25 }
 0x1f4   : > { %s1362_s25 = smov %s1121_s26  ;;  %s1363_s26 = smov %s1240_s11 }
 0x1f5   : > { %s1364_s27 = smov %s1228_s10  ;;  %24 = sbr.rel (!%p22_p2) target bundleno = 9 (0x9), region = 105 }
 0x1fa   :  { %630 = vsyncpa [#allocation3], 1 }
 0x1fb   :  { %632 = vsyncpa [#allocation3 + $0x1], 1 }
 0x1fc   :  { %633 = vsyncpa [#allocation6], 1 }
 0x1fd   :  { %634 = vsyncpa [#allocation9], 1 }
 0x1fe   :  { %635 = vsyncpa [#allocation4], 1 }
 0x1ff   :  { %637 = vsyncpa [#allocation4 + $0x1], 1 }

</bundles_post_ra>
